<compile_context>
chip_gen: v6e
topology: v6e:2x2x1
jax: 0.10.0
libtpu: 0.0.40
codegen_flags: <defaults>
</compile_context>

<pallas_src>
import functools
import math

import jax
import jax.numpy as jnp
from jax.experimental import pallas as pl
from jax.experimental.pallas import tpu as pltpu


def _encoder_layer_kernel(x_ref, wq_ref, wk_ref, wv_ref, bq_ref, bk_ref, bv_ref,
                          wo_ref, bo_ref, w1_ref, b1_ref, w2_ref, b2_ref,
                          ln1w_ref, ln1b_ref, ln2w_ref, ln2b_ref, o_ref,
                          *, nheads, head_dim, eps):
    # x_ref / o_ref: (S, D) blocks (leading batch dim squeezed away).
    x = x_ref[...].astype(jnp.float32)                       # (S, D)
    scale = jnp.float32(1.0 / math.sqrt(head_dim))

    # ---- multi-head self-attention (heads statically unrolled, nheads=2) ----
    attn = jnp.zeros(x.shape, dtype=jnp.float32)
    for h in range(nheads):
        q = jnp.dot(x, wq_ref[h], preferred_element_type=jnp.float32) + bq_ref[h]  # (S, Dh)
        k = jnp.dot(x, wk_ref[h], preferred_element_type=jnp.float32) + bk_ref[h]
        v = jnp.dot(x, wv_ref[h], preferred_element_type=jnp.float32) + bv_ref[h]
        # scores = (q * scale) @ k.T  without materializing a transpose
        s = jax.lax.dot_general(q * scale, k, (((1,), (1,)), ((), ())),
                                preferred_element_type=jnp.float32)                # (S, S)
        s = s - jnp.max(s, axis=-1, keepdims=True)
        p = jnp.exp(s)
        p = p / jnp.sum(p, axis=-1, keepdims=True)
        a = jnp.dot(p, v, preferred_element_type=jnp.float32)                      # (S, Dh)
        attn = attn + jnp.dot(a, wo_ref[h], preferred_element_type=jnp.float32)    # (S, D)
    attn = attn + bo_ref[...]

    def layer_norm(t, w, b):
        mu = jnp.mean(t, axis=-1, keepdims=True)
        var = jnp.mean(jnp.square(t - mu), axis=-1, keepdims=True)
        return (t - mu) * jax.lax.rsqrt(var + eps) * w + b

    # TODO(synk): training-mode dropout (attention / dropout1 / dropout / dropout2,
    # p=0.1) is identity in eval mode and is omitted here.
    h1 = layer_norm(x + attn, ln1w_ref[...], ln1b_ref[...])

    # ---- feed-forward: relu(h1 @ W1.T + b1) @ W2.T + b2 (weights pre-transposed) ----
    f = jnp.dot(h1, w1_ref[...], preferred_element_type=jnp.float32) + b1_ref[...]
    f = jnp.maximum(f, 0.0)
    f2 = jnp.dot(f, w2_ref[...], preferred_element_type=jnp.float32) + b2_ref[...]

    y = layer_norm(h1 + f2, ln2w_ref[...], ln2b_ref[...])
    o_ref[...] = y.astype(o_ref.dtype)


def cross_sectional_transformer_forward(assets, params, *, nheads, eps=1e-5):
    """assets: (S, B, D) float array (PyTorch batch_first=False layout).
    params: dict with the TransformerEncoderLayer tensors. Returns (S, B, D)."""
    S, B, D = assets.shape
    H = nheads
    assert D % H == 0, "asset_dim must be divisible by nheads"
    Dh = D // H
    F = params["w1"].shape[0]
    out_dtype = assets.dtype

    f32 = jnp.float32
    in_w = params["in_proj_weight"].astype(f32)          # (3D, D)
    in_b = params["in_proj_bias"].astype(f32)            # (3D,)
    wq, wk, wv = in_w[:D], in_w[D:2 * D], in_w[2 * D:]
    bq, bk, bv = in_b[:D], in_b[D:2 * D], in_b[2 * D:]

    def heads_t(w):
        # (D, D) -> (H, D, Dh) so that  x @ out[h] == x @ w[h*Dh:(h+1)*Dh, :].T
        return jnp.transpose(w.reshape(H, Dh, D), (0, 2, 1))

    wq_t, wk_t, wv_t = heads_t(wq), heads_t(wk), heads_t(wv)
    bq_h = bq.reshape(H, 1, Dh)
    bk_h = bk.reshape(H, 1, Dh)
    bv_h = bv.reshape(H, 1, Dh)

    # out_proj: per-head slice of Wo.T, shape (H, Dh, D)
    wo_h = params["out_proj_weight"].astype(f32).T.reshape(H, Dh, D)
    bo = params["out_proj_bias"].astype(f32).reshape(1, D)
    w1_t = params["w1"].astype(f32).T                    # (D, F)
    b1 = params["b1"].astype(f32).reshape(1, F)
    w2_t = params["w2"].astype(f32).T                    # (F, D)
    b2 = params["b2"].astype(f32).reshape(1, D)
    ln1w = params["ln1_w"].astype(f32).reshape(1, D)
    ln1b = params["ln1_b"].astype(f32).reshape(1, D)
    ln2w = params["ln2_w"].astype(f32).reshape(1, D)
    ln2b = params["ln2_b"].astype(f32).reshape(1, D)

    # (S, B, D) -> (B, S, D): per-batch blocks keep the last two block dims
    # equal to the full array dims (required for tiny D).
    x_bsd = jnp.transpose(assets, (1, 0, 2))

    weights = [wq_t, wk_t, wv_t, bq_h, bk_h, bv_h, wo_h, bo,
               w1_t, b1, w2_t, b2, ln1w, ln1b, ln2w, ln2b]

    def resident(a):
        # constant block index -> loaded to VMEM once, stays resident across grid
        return pl.BlockSpec(a.shape, lambda b, _nd=a.ndim: (0,) * _nd)

    kernel = functools.partial(_encoder_layer_kernel,
                               nheads=H, head_dim=Dh, eps=float(eps))

    y_bsd = pl.pallas_call(
        kernel,
        out_shape=jax.ShapeDtypeStruct((B, S, D), out_dtype),
        grid=(B,),
        in_specs=[pl.BlockSpec((None, S, D), lambda b: (b, 0, 0))]
                 + [resident(w) for w in weights],
        out_specs=pl.BlockSpec((None, S, D), lambda b: (b, 0, 0)),
        compiler_params=pltpu.CompilerParams(dimension_semantics=("parallel",)),
    )(x_bsd, *weights)

    return jnp.transpose(y_bsd, (1, 0, 2))


# ----------------------------- plain-JAX reference -----------------------------

def _layer_norm_ref(x, w, b, eps):
    mu = jnp.mean(x, axis=-1, keepdims=True)
    var = jnp.mean(jnp.square(x - mu), axis=-1, keepdims=True)
    return (x - mu) * jax.lax.rsqrt(var + eps) * w + b


def reference_forward(assets, params, nheads, eps=1e-5):
    S, B, D = assets.shape
    H = nheads
    Dh = D // H
    hp = jax.lax.Precision.HIGHEST
    x = assets.astype(jnp.float32)

    qkv = jnp.einsum("sbd,ed->sbe", x, params["in_proj_weight"], precision=hp) \
          + params["in_proj_bias"]
    q, k, v = qkv[..., :D], qkv[..., D:2 * D], qkv[..., 2 * D:]
    q = q.reshape(S, B, H, Dh) * (1.0 / math.sqrt(Dh))
    k = k.reshape(S, B, H, Dh)
    v = v.reshape(S, B, H, Dh)
    scores = jnp.einsum("sbhd,tbhd->bhst", q, k, precision=hp)
    p = jax.nn.softmax(scores, axis=-1)
    a = jnp.einsum("bhst,tbhd->sbhd", p, v, precision=hp).reshape(S, B, D)
    attn = jnp.einsum("sbe,de->sbd", a, params["out_proj_weight"], precision=hp) \
           + params["out_proj_bias"]

    h1 = _layer_norm_ref(x + attn, params["ln1_w"], params["ln1_b"], eps)
    f = jnp.maximum(jnp.einsum("sbd,fd->sbf", h1, params["w1"], precision=hp)
                    + params["b1"], 0.0)
    f2 = jnp.einsum("sbf,df->sbd", f, params["w2"], precision=hp) + params["b2"]
    return _layer_norm_ref(h1 + f2, params["ln2_w"], params["ln2_b"], eps)


if __name__ == "__main__":
    # Module hyper-params (defaults of CrossSectionalTransformer)
    asset_dim = 4
    nheads = 2
    dim_feedforward = asset_dim * 2

    # Small deterministic shapes
    seq_len, batch = 8, 2
    D, F = asset_dim, dim_feedforward

    key = jax.random.PRNGKey(0)
    ks = jax.random.split(key, 9)
    params = {
        "in_proj_weight": 0.3 * jax.random.normal(ks[0], (3 * D, D), jnp.float32),
        "in_proj_bias":   0.1 * jax.random.normal(ks[1], (3 * D,), jnp.float32),
        "out_proj_weight": 0.3 * jax.random.normal(ks[2], (D, D), jnp.float32),
        "out_proj_bias":  0.1 * jax.random.normal(ks[3], (D,), jnp.float32),
        "w1": 0.3 * jax.random.normal(ks[4], (F, D), jnp.float32),   # linear1.weight
        "b1": 0.1 * jax.random.normal(ks[5], (F,), jnp.float32),
        "w2": 0.3 * jax.random.normal(ks[6], (D, F), jnp.float32),   # linear2.weight
        "b2": 0.1 * jax.random.normal(ks[7], (D,), jnp.float32),
        "ln1_w": jnp.ones((D,), jnp.float32),
        "ln1_b": jnp.zeros((D,), jnp.float32),
        "ln2_w": jnp.ones((D,), jnp.float32),
        "ln2_b": jnp.zeros((D,), jnp.float32),
    }
    assets = jax.random.normal(ks[8], (seq_len, batch, D), jnp.float32)

    y = cross_sectional_transformer_forward(assets, params, nheads=nheads)
    y = jax.block_until_ready(y)

    ref = jax.block_until_ready(reference_forward(assets, params, nheads))

    assert y.shape == assets.shape
    assert jnp.allclose(y, ref, atol=1e-3, rtol=1e-3), (
        f"mismatch vs reference, max abs err = {jnp.max(jnp.abs(y - ref))}")

    print("KERNEL_OK")
</pallas_src>

<mosaic_0001>
module attributes {stable_mosaic.version = 11 : i64} {
  func.func @_encoder_layer_kernel(%arg0: i32, %arg1: memref<1x8x4xf32, #tpu.memory_space<vmem>>, %arg2: memref<2x4x2xf32, #tpu.memory_space<vmem>>, %arg3: memref<2x4x2xf32, #tpu.memory_space<vmem>>, %arg4: memref<2x4x2xf32, #tpu.memory_space<vmem>>, %arg5: memref<2x1x2xf32, #tpu.memory_space<vmem>>, %arg6: memref<2x1x2xf32, #tpu.memory_space<vmem>>, %arg7: memref<2x1x2xf32, #tpu.memory_space<vmem>>, %arg8: memref<2x2x4xf32, #tpu.memory_space<vmem>>, %arg9: memref<1x4xf32, #tpu.memory_space<vmem>>, %arg10: memref<4x8xf32, #tpu.memory_space<vmem>>, %arg11: memref<1x8xf32, #tpu.memory_space<vmem>>, %arg12: memref<8x4xf32, #tpu.memory_space<vmem>>, %arg13: memref<1x4xf32, #tpu.memory_space<vmem>>, %arg14: memref<1x4xf32, #tpu.memory_space<vmem>>, %arg15: memref<1x4xf32, #tpu.memory_space<vmem>>, %arg16: memref<1x4xf32, #tpu.memory_space<vmem>>, %arg17: memref<1x4xf32, #tpu.memory_space<vmem>>, %arg18: memref<1x8x4xf32, #tpu.memory_space<vmem>>) attributes {dimension_semantics = [#tpu.dimension_semantics<parallel>], iteration_bounds = array<i64: 2>, scalar_prefetch = 0 : i64, scratch_operands = 0 : i64, tpu.core_type = #tpu.core_type<tc>, window_params = [{transform_indices = @transform_0, window_bounds = array<i64: 1, 8, 4>}, {pipeline_mode = #tpu.pipeline_mode<synchronous>, transform_indices = @transform_1, window_bounds = array<i64: 2, 4, 2>}, {pipeline_mode = #tpu.pipeline_mode<synchronous>, transform_indices = @transform_2, window_bounds = array<i64: 2, 4, 2>}, {pipeline_mode = #tpu.pipeline_mode<synchronous>, transform_indices = @transform_3, window_bounds = array<i64: 2, 4, 2>}, {pipeline_mode = #tpu.pipeline_mode<synchronous>, transform_indices = @transform_4, window_bounds = array<i64: 2, 1, 2>}, {pipeline_mode = #tpu.pipeline_mode<synchronous>, transform_indices = @transform_5, window_bounds = array<i64: 2, 1, 2>}, {pipeline_mode = #tpu.pipeline_mode<synchronous>, transform_indices = @transform_6, window_bounds = array<i64: 2, 1, 2>}, {pipeline_mode = #tpu.pipeline_mode<synchronous>, transform_indices = @transform_7, window_bounds = array<i64: 2, 2, 4>}, {pipeline_mode = #tpu.pipeline_mode<synchronous>, transform_indices = @transform_8, window_bounds = array<i64: 1, 4>}, {pipeline_mode = #tpu.pipeline_mode<synchronous>, transform_indices = @transform_9, window_bounds = array<i64: 4, 8>}, {pipeline_mode = #tpu.pipeline_mode<synchronous>, transform_indices = @transform_10, window_bounds = array<i64: 1, 8>}, {pipeline_mode = #tpu.pipeline_mode<synchronous>, transform_indices = @transform_11, window_bounds = array<i64: 8, 4>}, {pipeline_mode = #tpu.pipeline_mode<synchronous>, transform_indices = @transform_12, window_bounds = array<i64: 1, 4>}, {pipeline_mode = #tpu.pipeline_mode<synchronous>, transform_indices = @transform_13, window_bounds = array<i64: 1, 4>}, {pipeline_mode = #tpu.pipeline_mode<synchronous>, transform_indices = @transform_14, window_bounds = array<i64: 1, 4>}, {pipeline_mode = #tpu.pipeline_mode<synchronous>, transform_indices = @transform_15, window_bounds = array<i64: 1, 4>}, {pipeline_mode = #tpu.pipeline_mode<synchronous>, transform_indices = @transform_16, window_bounds = array<i64: 1, 4>}, {transform_indices = @transform_17, window_bounds = array<i64: 1, 8, 4>}]} {
    %c0 = arith.constant 0 : index
    %c0_0 = arith.constant 0 : index
    %c0_1 = arith.constant 0 : index
    %0 = vector.load %arg1[%c0, %c0_0, %c0_1] : memref<1x8x4xf32, #tpu.memory_space<vmem>>, vector<1x8x4xf32>
    %1 = vector.shape_cast %0 : vector<1x8x4xf32> to vector<8x4xf32>
    %cst = arith.constant 0.000000e+00 : f32
    %2 = vector.broadcast %cst : f32 to vector<8x4xf32>
    %c0_2 = arith.constant 0 : index
    %c0_3 = arith.constant 0 : index
    %c0_4 = arith.constant 0 : index
    %3 = vector.load %arg2[%c0_2, %c0_3, %c0_4] : memref<2x4x2xf32, #tpu.memory_space<vmem>>, vector<1x4x2xf32>
    %4 = vector.shape_cast %3 : vector<1x4x2xf32> to vector<4x2xf32>
    %cst_5 = arith.constant dense<0.000000e+00> : vector<8x2xf32>
    %5 = tpu.matmul %1, %4, %cst_5 {dimension_numbers = #tpu.dot_dimension_numbers<[1], [0], [0], [1], [0, 0, 1, 1], [], []>} : vector<8x4xf32>, vector<4x2xf32>, vector<8x2xf32> -> vector<8x2xf32>
    %c0_6 = arith.constant 0 : index
    %c0_7 = arith.constant 0 : index
    %c0_8 = arith.constant 0 : index
    %6 = vector.load %arg5[%c0_6, %c0_7, %c0_8] : memref<2x1x2xf32, #tpu.memory_space<vmem>>, vector<1x1x2xf32>
    %7 = vector.shape_cast %6 : vector<1x1x2xf32> to vector<1x2xf32>
    %8 = vector.broadcast %7 : vector<1x2xf32> to vector<8x2xf32>
    %9 = arith.addf %5, %8 : vector<8x2xf32>
    %c0_9 = arith.constant 0 : index
    %c0_10 = arith.constant 0 : index
    %c0_11 = arith.constant 0 : index
    %10 = vector.load %arg3[%c0_9, %c0_10, %c0_11] : memref<2x4x2xf32, #tpu.memory_space<vmem>>, vector<1x4x2xf32>
    %11 = vector.shape_cast %10 : vector<1x4x2xf32> to vector<4x2xf32>
    %cst_12 = arith.constant dense<0.000000e+00> : vector<8x2xf32>
    %12 = tpu.matmul %1, %11, %cst_12 {dimension_numbers = #tpu.dot_dimension_numbers<[1], [0], [0], [1], [0, 0, 1, 1], [], []>} : vector<8x4xf32>, vector<4x2xf32>, vector<8x2xf32> -> vector<8x2xf32>
    %c0_13 = arith.constant 0 : index
    %c0_14 = arith.constant 0 : index
    %c0_15 = arith.constant 0 : index
    %13 = vector.load %arg6[%c0_13, %c0_14, %c0_15] : memref<2x1x2xf32, #tpu.memory_space<vmem>>, vector<1x1x2xf32>
    %14 = vector.shape_cast %13 : vector<1x1x2xf32> to vector<1x2xf32>
    %15 = vector.broadcast %14 : vector<1x2xf32> to vector<8x2xf32>
    %16 = arith.addf %12, %15 : vector<8x2xf32>
    %c0_16 = arith.constant 0 : index
    %c0_17 = arith.constant 0 : index
    %c0_18 = arith.constant 0 : index
    %17 = vector.load %arg4[%c0_16, %c0_17, %c0_18] : memref<2x4x2xf32, #tpu.memory_space<vmem>>, vector<1x4x2xf32>
    %18 = vector.shape_cast %17 : vector<1x4x2xf32> to vector<4x2xf32>
    %cst_19 = arith.constant dense<0.000000e+00> : vector<8x2xf32>
    %19 = tpu.matmul %1, %18, %cst_19 {dimension_numbers = #tpu.dot_dimension_numbers<[1], [0], [0], [1], [0, 0, 1, 1], [], []>} : vector<8x4xf32>, vector<4x2xf32>, vector<8x2xf32> -> vector<8x2xf32>
    %c0_20 = arith.constant 0 : index
    %c0_21 = arith.constant 0 : index
    %c0_22 = arith.constant 0 : index
    %20 = vector.load %arg7[%c0_20, %c0_21, %c0_22] : memref<2x1x2xf32, #tpu.memory_space<vmem>>, vector<1x1x2xf32>
    %21 = vector.shape_cast %20 : vector<1x1x2xf32> to vector<1x2xf32>
    %22 = vector.broadcast %21 : vector<1x2xf32> to vector<8x2xf32>
    %23 = arith.addf %19, %22 : vector<8x2xf32>
    %cst_23 = arith.constant 0.707106769 : f32
    %24 = vector.broadcast %cst_23 : f32 to vector<8x2xf32>
    %25 = arith.mulf %9, %24 : vector<8x2xf32>
    %cst_24 = arith.constant dense<0.000000e+00> : vector<8x8xf32>
    %26 = tpu.matmul %25, %16, %cst_24 {dimension_numbers = #tpu.dot_dimension_numbers<[1], [1], [0], [0], [0, 0, 1, 0], [], []>} : vector<8x2xf32>, vector<8x2xf32>, vector<8x8xf32> -> vector<8x8xf32>
    %cst_25 = arith.constant dense<0xFF800000> : vector<8xf32>
    %27 = vector.multi_reduction <maximumf>, %26, %cst_25 [1] : vector<8x8xf32> to vector<8xf32>
    %28 = vector.shape_cast %27 : vector<8xf32> to vector<8x1xf32>
    %29 = vector.broadcast %28 : vector<8x1xf32> to vector<8x8xf32>
    %30 = arith.subf %26, %29 : vector<8x8xf32>
    %31 = math.exp %30 : vector<8x8xf32>
    %cst_26 = arith.constant dense<0.000000e+00> : vector<8xf32>
    %32 = vector.multi_reduction <add>, %31, %cst_26 [1] : vector<8x8xf32> to vector<8xf32>
    %33 = vector.shape_cast %32 : vector<8xf32> to vector<8x1xf32>
    %34 = vector.broadcast %33 : vector<8x1xf32> to vector<8x8xf32>
    %35 = arith.divf %31, %34 : vector<8x8xf32>
    %cst_27 = arith.constant dense<0.000000e+00> : vector<8x2xf32>
    %36 = tpu.matmul %35, %23, %cst_27 {dimension_numbers = #tpu.dot_dimension_numbers<[1], [0], [0], [1], [0, 0, 1, 1], [], []>} : vector<8x8xf32>, vector<8x2xf32>, vector<8x2xf32> -> vector<8x2xf32>
    %c0_28 = arith.constant 0 : index
    %c0_29 = arith.constant 0 : index
    %c0_30 = arith.constant 0 : index
    %37 = vector.load %arg8[%c0_28, %c0_29, %c0_30] : memref<2x2x4xf32, #tpu.memory_space<vmem>>, vector<1x2x4xf32>
    %38 = vector.shape_cast %37 : vector<1x2x4xf32> to vector<2x4xf32>
    %cst_31 = arith.constant dense<0.000000e+00> : vector<8x4xf32>
    %39 = tpu.matmul %36, %38, %cst_31 {dimension_numbers = #tpu.dot_dimension_numbers<[1], [0], [0], [1], [0, 0, 1, 1], [], []>} : vector<8x2xf32>, vector<2x4xf32>, vector<8x4xf32> -> vector<8x4xf32>
    %40 = arith.addf %2, %39 : vector<8x4xf32>
    %c1 = arith.constant 1 : index
    %c0_32 = arith.constant 0 : index
    %c0_33 = arith.constant 0 : index
    %41 = vector.load %arg2[%c1, %c0_32, %c0_33] : memref<2x4x2xf32, #tpu.memory_space<vmem>>, vector<1x4x2xf32>
    %42 = vector.shape_cast %41 : vector<1x4x2xf32> to vector<4x2xf32>
    %cst_34 = arith.constant dense<0.000000e+00> : vector<8x2xf32>
    %43 = tpu.matmul %1, %42, %cst_34 {dimension_numbers = #tpu.dot_dimension_numbers<[1], [0], [0], [1], [0, 0, 1, 1], [], []>} : vector<8x4xf32>, vector<4x2xf32>, vector<8x2xf32> -> vector<8x2xf32>
    %c1_35 = arith.constant 1 : index
    %c0_36 = arith.constant 0 : index
    %c0_37 = arith.constant 0 : index
    %44 = vector.load %arg5[%c1_35, %c0_36, %c0_37] : memref<2x1x2xf32, #tpu.memory_space<vmem>>, vector<1x1x2xf32>
    %45 = vector.shape_cast %44 : vector<1x1x2xf32> to vector<1x2xf32>
    %46 = vector.broadcast %45 : vector<1x2xf32> to vector<8x2xf32>
    %47 = arith.addf %43, %46 : vector<8x2xf32>
    %c1_38 = arith.constant 1 : index
    %c0_39 = arith.constant 0 : index
    %c0_40 = arith.constant 0 : index
    %48 = vector.load %arg3[%c1_38, %c0_39, %c0_40] : memref<2x4x2xf32, #tpu.memory_space<vmem>>, vector<1x4x2xf32>
    %49 = vector.shape_cast %48 : vector<1x4x2xf32> to vector<4x2xf32>
    %cst_41 = arith.constant dense<0.000000e+00> : vector<8x2xf32>
    %50 = tpu.matmul %1, %49, %cst_41 {dimension_numbers = #tpu.dot_dimension_numbers<[1], [0], [0], [1], [0, 0, 1, 1], [], []>} : vector<8x4xf32>, vector<4x2xf32>, vector<8x2xf32> -> vector<8x2xf32>
    %c1_42 = arith.constant 1 : index
    %c0_43 = arith.constant 0 : index
    %c0_44 = arith.constant 0 : index
    %51 = vector.load %arg6[%c1_42, %c0_43, %c0_44] : memref<2x1x2xf32, #tpu.memory_space<vmem>>, vector<1x1x2xf32>
    %52 = vector.shape_cast %51 : vector<1x1x2xf32> to vector<1x2xf32>
    %53 = vector.broadcast %52 : vector<1x2xf32> to vector<8x2xf32>
    %54 = arith.addf %50, %53 : vector<8x2xf32>
    %c1_45 = arith.constant 1 : index
    %c0_46 = arith.constant 0 : index
    %c0_47 = arith.constant 0 : index
    %55 = vector.load %arg4[%c1_45, %c0_46, %c0_47] : memref<2x4x2xf32, #tpu.memory_space<vmem>>, vector<1x4x2xf32>
    %56 = vector.shape_cast %55 : vector<1x4x2xf32> to vector<4x2xf32>
    %cst_48 = arith.constant dense<0.000000e+00> : vector<8x2xf32>
    %57 = tpu.matmul %1, %56, %cst_48 {dimension_numbers = #tpu.dot_dimension_numbers<[1], [0], [0], [1], [0, 0, 1, 1], [], []>} : vector<8x4xf32>, vector<4x2xf32>, vector<8x2xf32> -> vector<8x2xf32>
    %c1_49 = arith.constant 1 : index
    %c0_50 = arith.constant 0 : index
    %c0_51 = arith.constant 0 : index
    %58 = vector.load %arg7[%c1_49, %c0_50, %c0_51] : memref<2x1x2xf32, #tpu.memory_space<vmem>>, vector<1x1x2xf32>
    %59 = vector.shape_cast %58 : vector<1x1x2xf32> to vector<1x2xf32>
    %60 = vector.broadcast %59 : vector<1x2xf32> to vector<8x2xf32>
    %61 = arith.addf %57, %60 : vector<8x2xf32>
    %cst_52 = arith.constant 0.707106769 : f32
    %62 = vector.broadcast %cst_52 : f32 to vector<8x2xf32>
    %63 = arith.mulf %47, %62 : vector<8x2xf32>
    %cst_53 = arith.constant dense<0.000000e+00> : vector<8x8xf32>
    %64 = tpu.matmul %63, %54, %cst_53 {dimension_numbers = #tpu.dot_dimension_numbers<[1], [1], [0], [0], [0, 0, 1, 0], [], []>} : vector<8x2xf32>, vector<8x2xf32>, vector<8x8xf32> -> vector<8x8xf32>
    %cst_54 = arith.constant dense<0xFF800000> : vector<8xf32>
    %65 = vector.multi_reduction <maximumf>, %64, %cst_54 [1] : vector<8x8xf32> to vector<8xf32>
    %66 = vector.shape_cast %65 : vector<8xf32> to vector<8x1xf32>
    %67 = vector.broadcast %66 : vector<8x1xf32> to vector<8x8xf32>
    %68 = arith.subf %64, %67 : vector<8x8xf32>
    %69 = math.exp %68 : vector<8x8xf32>
    %cst_55 = arith.constant dense<0.000000e+00> : vector<8xf32>
    %70 = vector.multi_reduction <add>, %69, %cst_55 [1] : vector<8x8xf32> to vector<8xf32>
    %71 = vector.shape_cast %70 : vector<8xf32> to vector<8x1xf32>
    %72 = vector.broadcast %71 : vector<8x1xf32> to vector<8x8xf32>
    %73 = arith.divf %69, %72 : vector<8x8xf32>
    %cst_56 = arith.constant dense<0.000000e+00> : vector<8x2xf32>
    %74 = tpu.matmul %73, %61, %cst_56 {dimension_numbers = #tpu.dot_dimension_numbers<[1], [0], [0], [1], [0, 0, 1, 1], [], []>} : vector<8x8xf32>, vector<8x2xf32>, vector<8x2xf32> -> vector<8x2xf32>
    %c1_57 = arith.constant 1 : index
    %c0_58 = arith.constant 0 : index
    %c0_59 = arith.constant 0 : index
    %75 = vector.load %arg8[%c1_57, %c0_58, %c0_59] : memref<2x2x4xf32, #tpu.memory_space<vmem>>, vector<1x2x4xf32>
    %76 = vector.shape_cast %75 : vector<1x2x4xf32> to vector<2x4xf32>
    %cst_60 = arith.constant dense<0.000000e+00> : vector<8x4xf32>
    %77 = tpu.matmul %74, %76, %cst_60 {dimension_numbers = #tpu.dot_dimension_numbers<[1], [0], [0], [1], [0, 0, 1, 1], [], []>} : vector<8x2xf32>, vector<2x4xf32>, vector<8x4xf32> -> vector<8x4xf32>
    %78 = arith.addf %40, %77 : vector<8x4xf32>
    %c0_61 = arith.constant 0 : index
    %c0_62 = arith.constant 0 : index
    %79 = vector.load %arg9[%c0_61, %c0_62] : memref<1x4xf32, #tpu.memory_space<vmem>>, vector<1x4xf32>
    %80 = vector.broadcast %79 : vector<1x4xf32> to vector<8x4xf32>
    %81 = arith.addf %78, %80 : vector<8x4xf32>
    %82 = arith.addf %1, %81 : vector<8x4xf32>
    %c0_63 = arith.constant 0 : index
    %c0_64 = arith.constant 0 : index
    %83 = vector.load %arg14[%c0_63, %c0_64] : memref<1x4xf32, #tpu.memory_space<vmem>>, vector<1x4xf32>
    %c0_65 = arith.constant 0 : index
    %c0_66 = arith.constant 0 : index
    %84 = vector.load %arg15[%c0_65, %c0_66] : memref<1x4xf32, #tpu.memory_space<vmem>>, vector<1x4xf32>
    %cst_67 = arith.constant dense<0.000000e+00> : vector<8xf32>
    %85 = vector.multi_reduction <add>, %82, %cst_67 [1] : vector<8x4xf32> to vector<8xf32>
    %86 = vector.shape_cast %85 : vector<8xf32> to vector<8x1xf32>
    %cst_68 = arith.constant 4.000000e+00 : f32
    %87 = vector.broadcast %cst_68 : f32 to vector<8x1xf32>
    %88 = arith.divf %86, %87 : vector<8x1xf32>
    %89 = vector.broadcast %88 : vector<8x1xf32> to vector<8x4xf32>
    %90 = arith.subf %82, %89 : vector<8x4xf32>
    %91 = arith.mulf %90, %90 : vector<8x4xf32>
    %cst_69 = arith.constant dense<0.000000e+00> : vector<8xf32>
    %92 = vector.multi_reduction <add>, %91, %cst_69 [1] : vector<8x4xf32> to vector<8xf32>
    %93 = vector.shape_cast %92 : vector<8xf32> to vector<8x1xf32>
    %cst_70 = arith.constant 4.000000e+00 : f32
    %94 = vector.broadcast %cst_70 : f32 to vector<8x1xf32>
    %95 = arith.divf %93, %94 : vector<8x1xf32>
    %96 = vector.broadcast %88 : vector<8x1xf32> to vector<8x4xf32>
    %97 = arith.subf %82, %96 : vector<8x4xf32>
    %cst_71 = arith.constant 9.99999974E-6 : f32
    %98 = vector.broadcast %cst_71 : f32 to vector<8x1xf32>
    %99 = arith.addf %95, %98 : vector<8x1xf32>
    %100 = math.rsqrt %99 : vector<8x1xf32>
    %101 = vector.broadcast %100 : vector<8x1xf32> to vector<8x4xf32>
    %102 = arith.mulf %97, %101 : vector<8x4xf32>
    %103 = vector.broadcast %83 : vector<1x4xf32> to vector<8x4xf32>
    %104 = arith.mulf %102, %103 : vector<8x4xf32>
    %105 = vector.broadcast %84 : vector<1x4xf32> to vector<8x4xf32>
    %106 = arith.addf %104, %105 : vector<8x4xf32>
    %c0_72 = arith.constant 0 : index
    %c0_73 = arith.constant 0 : index
    %107 = vector.load %arg10[%c0_72, %c0_73] : memref<4x8xf32, #tpu.memory_space<vmem>>, vector<4x8xf32>
    %cst_74 = arith.constant dense<0.000000e+00> : vector<8x8xf32>
    %108 = tpu.matmul %106, %107, %cst_74 {dimension_numbers = #tpu.dot_dimension_numbers<[1], [0], [0], [1], [0, 0, 1, 1], [], []>} : vector<8x4xf32>, vector<4x8xf32>, vector<8x8xf32> -> vector<8x8xf32>
    %c0_75 = arith.constant 0 : index
    %c0_76 = arith.constant 0 : index
    %109 = vector.load %arg11[%c0_75, %c0_76] : memref<1x8xf32, #tpu.memory_space<vmem>>, vector<1x8xf32>
    %110 = vector.broadcast %109 : vector<1x8xf32> to vector<8x8xf32>
    %111 = arith.addf %108, %110 : vector<8x8xf32>
    %cst_77 = arith.constant 0.000000e+00 : f32
    %112 = vector.broadcast %cst_77 : f32 to vector<8x8xf32>
    %113 = arith.maximumf %111, %112 : vector<8x8xf32>
    %c0_78 = arith.constant 0 : index
    %c0_79 = arith.constant 0 : index
    %114 = vector.load %arg12[%c0_78, %c0_79] : memref<8x4xf32, #tpu.memory_space<vmem>>, vector<8x4xf32>
    %cst_80 = arith.constant dense<0.000000e+00> : vector<8x4xf32>
    %115 = tpu.matmul %113, %114, %cst_80 {dimension_numbers = #tpu.dot_dimension_numbers<[1], [0], [0], [1], [0, 0, 1, 1], [], []>} : vector<8x8xf32>, vector<8x4xf32>, vector<8x4xf32> -> vector<8x4xf32>
    %c0_81 = arith.constant 0 : index
    %c0_82 = arith.constant 0 : index
    %116 = vector.load %arg13[%c0_81, %c0_82] : memref<1x4xf32, #tpu.memory_space<vmem>>, vector<1x4xf32>
    %117 = vector.broadcast %116 : vector<1x4xf32> to vector<8x4xf32>
    %118 = arith.addf %115, %117 : vector<8x4xf32>
    %119 = arith.addf %106, %118 : vector<8x4xf32>
    %c0_83 = arith.constant 0 : index
    %c0_84 = arith.constant 0 : index
    %120 = vector.load %arg16[%c0_83, %c0_84] : memref<1x4xf32, #tpu.memory_space<vmem>>, vector<1x4xf32>
    %c0_85 = arith.constant 0 : index
    %c0_86 = arith.constant 0 : index
    %121 = vector.load %arg17[%c0_85, %c0_86] : memref<1x4xf32, #tpu.memory_space<vmem>>, vector<1x4xf32>
    %cst_87 = arith.constant dense<0.000000e+00> : vector<8xf32>
    %122 = vector.multi_reduction <add>, %119, %cst_87 [1] : vector<8x4xf32> to vector<8xf32>
    %123 = vector.shape_cast %122 : vector<8xf32> to vector<8x1xf32>
    %cst_88 = arith.constant 4.000000e+00 : f32
    %124 = vector.broadcast %cst_88 : f32 to vector<8x1xf32>
    %125 = arith.divf %123, %124 : vector<8x1xf32>
    %126 = vector.broadcast %125 : vector<8x1xf32> to vector<8x4xf32>
    %127 = arith.subf %119, %126 : vector<8x4xf32>
    %128 = arith.mulf %127, %127 : vector<8x4xf32>
    %cst_89 = arith.constant dense<0.000000e+00> : vector<8xf32>
    %129 = vector.multi_reduction <add>, %128, %cst_89 [1] : vector<8x4xf32> to vector<8xf32>
    %130 = vector.shape_cast %129 : vector<8xf32> to vector<8x1xf32>
    %cst_90 = arith.constant 4.000000e+00 : f32
    %131 = vector.broadcast %cst_90 : f32 to vector<8x1xf32>
    %132 = arith.divf %130, %131 : vector<8x1xf32>
    %133 = vector.broadcast %125 : vector<8x1xf32> to vector<8x4xf32>
    %134 = arith.subf %119, %133 : vector<8x4xf32>
    %cst_91 = arith.constant 9.99999974E-6 : f32
    %135 = vector.broadcast %cst_91 : f32 to vector<8x1xf32>
    %136 = arith.addf %132, %135 : vector<8x1xf32>
    %137 = math.rsqrt %136 : vector<8x1xf32>
    %138 = vector.broadcast %137 : vector<8x1xf32> to vector<8x4xf32>
    %139 = arith.mulf %134, %138 : vector<8x4xf32>
    %140 = vector.broadcast %120 : vector<1x4xf32> to vector<8x4xf32>
    %141 = arith.mulf %139, %140 : vector<8x4xf32>
    %142 = vector.broadcast %121 : vector<1x4xf32> to vector<8x4xf32>
    %143 = arith.addf %141, %142 : vector<8x4xf32>
    %c0_92 = arith.constant 0 : index
    %c0_93 = arith.constant 0 : index
    %c0_94 = arith.constant 0 : index
    %144 = vector.load %arg18[%c0_92, %c0_93, %c0_94] : memref<1x8x4xf32, #tpu.memory_space<vmem>>, vector<1x8x4xf32>
    %145 = vector.shape_cast %144 : vector<1x8x4xf32> to vector<8x4xf32>
    %146 = vector.shape_cast %143 : vector<8x4xf32> to vector<1x8x4xf32>
    tpu.vector_store %arg18[%c0_92, %c0_93, %c0_94], %146 {strides = array<i32>} : memref<1x8x4xf32, #tpu.memory_space<vmem>>, vector<1x8x4xf32>,
    return
  }
  func.func @transform_0(%arg0: i32) -> (i32, i32, i32) {
    %c0_i32 = arith.constant 0 : i32
    %c0_i32_0 = arith.constant 0 : i32
    %c0_i32_1 = arith.constant 0 : i32
    return %arg0, %c0_i32, %c0_i32_0 : i32, i32, i32
  }
  func.func @transform_1(%arg0: i32) -> (i32, i32, i32) {
    %c0_i32 = arith.constant 0 : i32
    %c0_i32_0 = arith.constant 0 : i32
    %c0_i32_1 = arith.constant 0 : i32
    %c0_i32_2 = arith.constant 0 : i32
    return %c0_i32, %c0_i32_0, %c0_i32_1 : i32, i32, i32
  }
  func.func @transform_2(%arg0: i32) -> (i32, i32, i32) {
    %c0_i32 = arith.constant 0 : i32
    %c0_i32_0 = arith.constant 0 : i32
    %c0_i32_1 = arith.constant 0 : i32
    %c0_i32_2 = arith.constant 0 : i32
    return %c0_i32, %c0_i32_0, %c0_i32_1 : i32, i32, i32
  }
  func.func @transform_3(%arg0: i32) -> (i32, i32, i32) {
    %c0_i32 = arith.constant 0 : i32
    %c0_i32_0 = arith.constant 0 : i32
    %c0_i32_1 = arith.constant 0 : i32
    %c0_i32_2 = arith.constant 0 : i32
    return %c0_i32, %c0_i32_0, %c0_i32_1 : i32, i32, i32
  }
  func.func @transform_4(%arg0: i32) -> (i32, i32, i32) {
    %c0_i32 = arith.constant 0 : i32
    %c0_i32_0 = arith.constant 0 : i32
    %c0_i32_1 = arith.constant 0 : i32
    %c0_i32_2 = arith.constant 0 : i32
    return %c0_i32, %c0_i32_0, %c0_i32_1 : i32, i32, i32
  }
  func.func @transform_5(%arg0: i32) -> (i32, i32, i32) {
    %c0_i32 = arith.constant 0 : i32
    %c0_i32_0 = arith.constant 0 : i32
    %c0_i32_1 = arith.constant 0 : i32
    %c0_i32_2 = arith.constant 0 : i32
    return %c0_i32, %c0_i32_0, %c0_i32_1 : i32, i32, i32
  }
  func.func @transform_6(%arg0: i32) -> (i32, i32, i32) {
    %c0_i32 = arith.constant 0 : i32
    %c0_i32_0 = arith.constant 0 : i32
    %c0_i32_1 = arith.constant 0 : i32
    %c0_i32_2 = arith.constant 0 : i32
    return %c0_i32, %c0_i32_0, %c0_i32_1 : i32, i32, i32
  }
  func.func @transform_7(%arg0: i32) -> (i32, i32, i32) {
    %c0_i32 = arith.constant 0 : i32
    %c0_i32_0 = arith.constant 0 : i32
    %c0_i32_1 = arith.constant 0 : i32
    %c0_i32_2 = arith.constant 0 : i32
    return %c0_i32, %c0_i32_0, %c0_i32_1 : i32, i32, i32
  }
  func.func @transform_8(%arg0: i32) -> (i32, i32) {
    %c0_i32 = arith.constant 0 : i32
    %c0_i32_0 = arith.constant 0 : i32
    %c0_i32_1 = arith.constant 0 : i32
    return %c0_i32, %c0_i32_0 : i32, i32
  }
  func.func @transform_9(%arg0: i32) -> (i32, i32) {
    %c0_i32 = arith.constant 0 : i32
    %c0_i32_0 = arith.constant 0 : i32
    %c0_i32_1 = arith.constant 0 : i32
    return %c0_i32, %c0_i32_0 : i32, i32
  }
  func.func @transform_10(%arg0: i32) -> (i32, i32) {
    %c0_i32 = arith.constant 0 : i32
    %c0_i32_0 = arith.constant 0 : i32
    %c0_i32_1 = arith.constant 0 : i32
    return %c0_i32, %c0_i32_0 : i32, i32
  }
  func.func @transform_11(%arg0: i32) -> (i32, i32) {
    %c0_i32 = arith.constant 0 : i32
    %c0_i32_0 = arith.constant 0 : i32
    %c0_i32_1 = arith.constant 0 : i32
    return %c0_i32, %c0_i32_0 : i32, i32
  }
  func.func @transform_12(%arg0: i32) -> (i32, i32) {
    %c0_i32 = arith.constant 0 : i32
    %c0_i32_0 = arith.constant 0 : i32
    %c0_i32_1 = arith.constant 0 : i32
    return %c0_i32, %c0_i32_0 : i32, i32
  }
  func.func @transform_13(%arg0: i32) -> (i32, i32) {
    %c0_i32 = arith.constant 0 : i32
    %c0_i32_0 = arith.constant 0 : i32
    %c0_i32_1 = arith.constant 0 : i32
    return %c0_i32, %c0_i32_0 : i32, i32
  }
  func.func @transform_14(%arg0: i32) -> (i32, i32) {
    %c0_i32 = arith.constant 0 : i32
    %c0_i32_0 = arith.constant 0 : i32
    %c0_i32_1 = arith.constant 0 : i32
    return %c0_i32, %c0_i32_0 : i32, i32
  }
  func.func @transform_15(%arg0: i32) -> (i32, i32) {
    %c0_i32 = arith.constant 0 : i32
    %c0_i32_0 = arith.constant 0 : i32
    %c0_i32_1 = arith.constant 0 : i32
    return %c0_i32, %c0_i32_0 : i32, i32
  }
  func.func @transform_16(%arg0: i32) -> (i32, i32) {
    %c0_i32 = arith.constant 0 : i32
    %c0_i32_0 = arith.constant 0 : i32
    %c0_i32_1 = arith.constant 0 : i32
    return %c0_i32, %c0_i32_0 : i32, i32
  }
  func.func @transform_17(%arg0: i32) -> (i32, i32, i32) {
    %c0_i32 = arith.constant 0 : i32
    %c0_i32_0 = arith.constant 0 : i32
    %c0_i32_1 = arith.constant 0 : i32
    return %arg0, %c0_i32, %c0_i32_0 : i32, i32, i32
  }
}

</mosaic_0001>

<bundles_post_ra>
// kernel: tpu_custom_call.1
= control target key start
LH: loop header
LB: loop body
LE: loop exit
PB: predicated region body
PF: predicated region fallthrough
CT: control target
= control target key end

     0   :  { %s2085_s24 = smov 0   ;;  %s2261_s0 = inlined_call_operand.vmem [shape: f32[2,8,4], index: 0, kind: input, shape index: {}]   ;;  %s2262_s1 = inlined_call_operand.vmem [shape: f32[2,4,2], index: 1, kind: input, shape index: {}]   ;;  %s2263_s2 = inlined_call_operand.vmem [shape: f32[2,4,2], index: 2, kind: input, shape index: {}]   ;;  %s2264_s3 = inlined_call_operand.vmem [shape: f32[2,4,2], index: 3, kind: input, shape index: {}]   ;;  %s2265_s4 = inlined_call_operand.vmem [shape: f32[2,1,2], index: 4, kind: input, shape index: {}]   ;;  %s2266_s5 = inlined_call_operand.vmem [shape: f32[2,1,2], index: 5, kind: input, shape index: {}]   ;;  %s2267_s6 = inlined_call_operand.vmem [shape: f32[2,1,2], index: 6, kind: input, shape index: {}]   ;;  %s2268_s7 = inlined_call_operand.vmem [shape: f32[2,2,4], index: 7, kind: input, shape index: {}]   ;;  %s2269_s8 = inlined_call_operand.vmem [shape: f32[1,4], index: 8, kind: input, shape index: {}]   ;;  %s2270_s9 = inlined_call_operand.vmem [shape: f32[4,8], index: 9, kind: input, shape index: {}]   ;;  %s2271_s10 = inlined_call_operand.vmem [shape: f32[1,8], index: 10, kind: input, shape index: {}]   ;;  %s2272_s11 = inlined_call_operand.vmem [shape: f32[8,4], index: 11, kind: input, shape index: {}]   ;;  %s2273_s12 = inlined_call_operand.vmem [shape: f32[1,4], index: 12, kind: input, shape index: {}]   ;;  %s2274_s13 = inlined_call_operand.vmem [shape: f32[1,4], index: 13, kind: input, shape index: {}]   ;;  %s2275_s14 = inlined_call_operand.vmem [shape: f32[1,4], index: 14, kind: input, shape index: {}]   ;;  %s2276_s15 = inlined_call_operand.vmem [shape: f32[1,4], index: 15, kind: input, shape index: {}]   ;;  %s2277_s16 = inlined_call_operand.vmem [shape: f32[1,4], index: 16, kind: input, shape index: {}]   ;;  %s2278_s17 = inlined_call_operand.vmem [shape: f32[2,8,4], index: 17, kind: output, shape index: {}]  }
   0x1   :  { %2280 = sst [smem:[#allocation2_spill]] %s2261_s0 }
   0x2   :  { %2281 = sst [smem:[#allocation3_spill]] %s2262_s1 }
   0x3 LB: > { %s1811_s25 = sadd.s32 4294967295, %s1991_s24   ;;  %p1815_p0 = scmp.ge.s32.totalorder %s1991_s24, 1  ;;  %s1991_s24 = sphi %s2085_s24, %s27_s24  }
   0x4   : > { %p486_p1 = scmp.lt.s32.totalorder %s1991_s24, 3 }
   0x6   : > { %p487_p2 = pnand %p1815_p0, %p486_p1 }
   0x7   : > { %s2282_s28 = sld [smem:[#allocation3_spill]] (!%p487_p2)  ;;  %p536_p3 = scmp.lt.s32.totalorder (!%p487_p2), %s1811_s25, 1 }
   0x8   : > { %490 = sbr.rel (%p487_p2) target bundleno = 2831 (0xb0f), region = 88  ;;  %s2283_s1 = sld [smem:[#allocation2_spill]] (!%p487_p2) }
   0xd   : > { %v545_v0 = vld [vmem:[%s2282_s28] sm:$0xf]  ;;  %vm557_vm0 = vcmask 1043456   ;;  %v1993_v1 = vmov 0.0   ;;  %vm1994_vm1 = vmmov 0   ;;  %s2285_s25 = smov (!%p536_p3, %s1811_s25), 1 }
   0xe   : > { %1893 = vmatprep.subr.mxu0 %v1993_v1  ;;  %1898 = vmatprep.subr.mxu1 %v1993_v1  ;;  %v631_v2 = vld [vmem:[%s2263_s2] sm:$0xf]  ;;  %s1816_s30 = sshll.u32 %s2285_s25, 3  ;;  %vm553_vm2 = vcmask 31744   ;;  %vm794_vm3 = vcmask 15360   ;;  %vm871_vm4 = vcmask 64512  }
   0xf   : > { %1894 = vmatpush3.msk.msra.mxu0 %vm557_vm0, %v545_v0  ;;  %1895 = vmatprep.mubr.msk.f32.mxu0 %vm1994_vm1, %v1993_v1  ;;  %s539_s20 = scalar_lea.vmem %s2283_s1, %s1816_s30  ;;  %v1818_v4 = vld [vmem:[%s2265_s4] ss:$0 sm:$0xff]  ;;  %v1830_v26 = vld [vmem:[%s2282_s28 + $0x4] sm:$0xf]  ;;  %v1832_v33 = vld [vmem:[%s2265_s4 + $0x1] ss:$0 sm:$0xff]  ;;  %s543_s21 = scalar_lea.vmem %s2278_s17, %s1816_s30 }
  0x10   : > { %1899 = vmatpush3.msk.msra.mxu1 %vm557_vm0, %v631_v2  ;;  %1900 = vmatprep.mubr.msk.f32.mxu1 %vm1994_vm1, %v1993_v1  ;;  %v2117_v3 = vld [vmem:[%s539_s20] sm:$0xff]  ;;  %vm1372_vm5 = vcmask 1041408  }
  0x11   : > { %1908 = vmatprep.subr.mxu1 %v1993_v1  ;;  %1903 = vmatprep.subr.mxu0 %v1993_v1  ;;  %v1821_v5 = vld [vmem:[%s2266_s5] ss:$0 sm:$0xff]  ;;  %v1835_v30 = vld [vmem:[%s2263_s2 + $0x4] sm:$0xf]  ;;  %v1837_v37 = vld [vmem:[%s2266_s5 + $0x1] ss:$0 sm:$0xff] }
  0x12   : > { %1896 = vmatmul.mubr.msk.f32.vlgmr.msra.gmra.mxu0 %vm553_vm2, %v2117_v3  ;;  %1901 = vmatmul.mubr.msk.f32.vlgmr.msra.gmra.mxu1 %vm553_vm2, %v2117_v3  ;;  %v712_v13 = vld [vmem:[%s2264_s3] sm:$0xf]  ;;  %v1840_v42 = vld [vmem:[%s2264_s3 + $0x4] sm:$0xf] }
  0x13   : > { %1910 = vmatprep.mubr.msk.f32.mxu1 %vm1994_vm1, %v1993_v1  ;;  %1905 = vmatprep.mubr.msk.f32.mxu0 %vm1994_vm1, %v1993_v1  ;;  %v1824_v22 = vld [vmem:[%s2267_s6] ss:$0 sm:$0xff]  ;;  %v1842_v51 = vld [vmem:[%s2267_s6 + $0x1] ss:$0 sm:$0xff]  ;;  %v1848_v55 = vld [vmem:[%s2268_s7 + $0x2] sm:$0x3] }
  0x14   : > { %1904 = vmatpush3.msk.msra.mxu0 %vm557_vm0, %v712_v13  ;;  %v956_v59 = vld [vmem:[%s2268_s7] sm:$0x3] }
  0x15   : > { %1913 = vmatprep.subr.mxu0 %v1993_v1  ;;  %v1853_v2 = vld [vmem:[%s2269_s8] ss:$0 sm:$0xff] }
  0x16   : > { %1906 = vmatmul.mubr.msk.f32.vlgmr.msra.gmra.mxu0 %vm553_vm2, %v2117_v3  ;;  %v1561_v13 = vld [vmem:[%s2270_s9] sm:$0xf] }
  0x17   : > { %1915 = vmatprep.mubr.msk.f32.mxu0 %vm1994_vm1, %v1993_v1 }
  0xd2   : > { %v627_v6 = vpop.f32.mrf.mxu0  ;;  %v708_v7 = vpop.f32.mrf.mxu1 }
  0xd3   : > { %v628_v8 = vadd.f32 %v1818_v4, %v627_v6  ;;  %v709_v9 = vadd.f32 %v1821_v5, %v708_v7 }
  0xd4   : > { %v1897_v10 = vpop.f32.mrf.mxu0  ;;  %v1902_v11 = vpop.f32.mrf.mxu1 }
  0xd5   : > { %v793_v12 = vmul.f32 0.70710677, %v628_v8  ;;  %1909 = vmatpush3.xpose.msk.msra.mxu1 %vm794_vm3, %v709_v9 }
  0xd6   : > { %1918 = vmatprep.subr.mxu1 %v1993_v1  ;;  %v789_v23 = vpop.f32.mrf.mxu0 }
  0xd7   : > { %v790_v24 = vadd.f32 %v1824_v22, %v789_v23  ;;  %v1646_v22 = vld [vmem:[%s2272_s11] sm:$0xff] }
  0xd8   : > { %1911 = vmatmul.mubr.msk.f32.vlgmr.msra.gmra.mxu1 %vm794_vm3, %v793_v12  ;;  %v1907_v25 = vpop.f32.mrf.mxu0  ;;  %v1856_v23 = vld [vmem:[%s2271_s10] ss:$0 sm:$0xff] }
  0xd9   : > { %1920 = vmatprep.mubr.msk.f32.mxu1 %vm1994_vm1, %v1993_v1  ;;  %1914 = vmatpush3.msra.mxu0 %v790_v24 }
  0xda   : > { %1923 = vmatprep.subr.mxu0 %v1993_v1  ;;  %1919 = vmatpush3.msk.msra.mxu1 %vm557_vm0, %v1830_v26 }
  0xdb   : > { %1928 = vmatprep.subr.mxu1 %v1993_v1 }
  0xdc   : > { %1921 = vmatmul.mubr.msk.f32.vlgmr.msra.gmra.mxu1 %vm553_vm2, %v2117_v3 }
  0xdd   : > { %1930 = vmatprep.mubr.msk.f32.mxu1 %vm1994_vm1, %v1993_v1  ;;  %1929 = vmatpush3.msk.msra.mxu1 %vm557_vm0, %v1840_v42 }
  0xde   : > { %1938 = vmatprep.subr.mxu1 %v1993_v1 }
  0xe0   : > { %1931 = vmatmul.mubr.msk.f32.vlgmr.msra.gmra.mxu1 %vm553_vm2, %v2117_v3 }
  0xe1   : > { %1940 = vmatprep.mubr.msk.f32.mxu1 %vm1994_vm1, %v1993_v1 }
 0x198   : > { %v867_v14 = vpop.f32.mrf.mxu1 }
 0x199   : > { %v872_v15 = vsel %vm871_vm4, %v867_v14, -inf }
 0x19a   : > { %873 = vmax.xlane.f32.xlu0 %v872_v15  ;;  %v1912_v16 = vpop.f32.mrf.mxu1 }
 0x19c   : > { %v1036_v31 = vpop.f32.mrf.mxu1 }
 0x19d   : > { %v1037_v36 = vadd.f32 %v1832_v33, %v1036_v31 }
 0x19e   : > { %v1922_v32 = vpop.f32.mrf.mxu1 }
 0x19f   : > { %v1206_v40 = vmul.f32 0.70710677, %v1037_v36 }
 0x1a0   : > { %v1202_v52 = vpop.f32.mrf.mxu1 }
 0x1a1   : > { %v1203_v53 = vadd.f32 %v1842_v51, %v1202_v52 }
 0x1a2   : > { %v1932_v54 = vpop.f32.mrf.mxu1 }
 0x1a3   : > { %1939 = vmatpush3.msra.mxu1 %v1203_v53 }
 0x1a4   : > { %1948 = vmatprep.subr.mxu1 %v1993_v1 }
 0x223   : > { %v874_v17 = vpop.xlane.xlu0 %873 }
 0x224   : > { %v875_v18 = vsub.f32 %v867_v14, %v874_v17  ;;  %v1854_v17 = vld [vmem:[%s2274_s13] ss:$0 sm:$0xff] }
 0x226   : > { %v876_v19 = vmul.f32 1.442695, %v875_v18 }
 0x228   : > { %1973 = vpow2.f32 %v876_v19  ;;  %v1855_v19 = vld [vmem:[%s2275_s14] ss:$0 sm:$0xff] }
 0x235   : > { %v1974_v20 = vpop.eup %1973 }
 0x236   : > { %v878_v21 = vsel %vm871_vm4, %v1974_v20, 0.0 }
 0x237   : > { %879 = vadd.xlane.f32.xlu0 %v878_v21 }
 0x2c0   : > { %v880_v27 = vpop.xlane.xlu0 %879 }
 0x2c1   : > { %1975 = vrcp.f32 %v880_v27 }
 0x2ce   : > { %v1976_v28 = vpop.eup %1975 }
 0x2cf   : > { %v882_v29 = vmul.f32 %v1976_v28, %v1974_v20  ;;  %v1859_v28 = vld [vmem:[%s2273_s12] ss:$0 sm:$0xff] }
 0x2d1   : > { %1916 = vmatmul.mubr.msk.f32.vlgmr.msra.gmra.mxu0 %vm871_vm4, %v882_v29 }
 0x2d2   : > { %1924 = vmatpush3.msk.msra.mxu0 %vm557_vm0, %v1835_v30  ;;  %1925 = vmatprep.mubr.msk.f32.mxu0 %vm1994_vm1, %v1993_v1 }
 0x2d3   : > { %1933 = vmatprep.subr.mxu0 %v1993_v1 }
 0x2d5   : > { %1926 = vmatmul.mubr.msk.f32.vlgmr.msra.gmra.mxu0 %vm553_vm2, %v2117_v3 }
 0x2d6   : > { %1935 = vmatprep.mubr.msk.f32.mxu0 %vm1994_vm1, %v1993_v1 }
 0x391   : > { %v952_v34 = vpop.f32.mrf.mxu0 }
 0x393   : > { %v1917_v35 = vpop.f32.mrf.mxu0 }
 0x395   : > { %v1119_v38 = vpop.f32.mrf.mxu0 }
 0x396   : > { %v1120_v39 = vadd.f32 %v1837_v37, %v1119_v38 }
 0x397   : > { %v1927_v41 = vpop.f32.mrf.mxu0 }
 0x398   : > { %1934 = vmatpush3.xpose.msk.msra.mxu0 %vm794_vm3, %v1120_v39 }
 0x399   : > { %1943 = vmatprep.subr.mxu0 %v1993_v1 }
 0x39b   : > { %1936 = vmatmul.mubr.msk.f32.vlgmr.msra.gmra.mxu0 %vm794_vm3, %v1206_v40 }
 0x39c   : > { %1945 = vmatprep.mubr.msk.f32.mxu0 %vm1994_vm1, %v1993_v1  ;;  %1944 = vmatpush3.msk.msra.mxu0 %vm1372_vm5, %v1848_v55 }
 0x39d   : > { %1953 = vmatprep.subr.mxu0 %v1993_v1 }
 0x45b   : > { %v1279_v43 = vpop.f32.mrf.mxu0 }
 0x45c   : > { %v1283_v44 = vsel %vm871_vm4, %v1279_v43, -inf }
 0x45d   : > { %1284 = vmax.xlane.f32.xlu1 %v1283_v44  ;;  %v1937_v45 = vpop.f32.mrf.mxu0 }
 0x45e   : > { %v1862_v45 = vld [vmem:[%s2277_s16] ss:$0 sm:$0xff] }
 0x4e6   : > { %v1285_v46 = vpop.xlane.xlu1 %1284 }
 0x4e7   : > { %v1286_v47 = vsub.f32 %v1279_v43, %v1285_v46  ;;  %v1861_v43 = vld [vmem:[%s2276_s15] ss:$0 sm:$0xff] }
 0x4e9   : > { %v1287_v48 = vmul.f32 1.442695, %v1286_v47 }
 0x4eb   : > { %1977 = vpow2.f32 %v1287_v48 }
 0x4f8   : > { %v1978_v49 = vpop.eup %1977 }
 0x4f9   : > { %v1289_v50 = vsel %vm871_vm4, %v1978_v49, 0.0 }
 0x4fa   : > { %1290 = vadd.xlane.f32.xlu1 %v1289_v50 }
 0x583   : > { %v1291_v56 = vpop.xlane.xlu1 %1290 }
 0x584   : > { %1979 = vrcp.f32 %v1291_v56 }
 0x591   : > { %v1980_v57 = vpop.eup %1979 }
 0x592   : > { %v1293_v58 = vmul.f32 %v1980_v57, %v1978_v49 }
 0x594   : > { %1941 = vmatmul.mubr.msk.f32.vlgmr.msra.gmra.mxu1 %vm871_vm4, %v1293_v58 }
 0x595   : > { %1949 = vmatpush3.msk.msra.mxu1 %vm1372_vm5, %v956_v59  ;;  %1950 = vmatprep.mubr.msk.f32.mxu1 %vm1994_vm1, %v1993_v1 }
 0x596   : > { %1958 = vmatprep.subr.mxu1 %v1993_v1 }
 0x598   : > { %1951 = vmatmul.mubr.msk.f32.vlgmr.msra.gmra.mxu1 %vm794_vm3, %v952_v34 }
 0x599   : > { %1960 = vmatprep.mubr.msk.f32.mxu1 %vm1994_vm1, %v1993_v1  ;;  %1959 = vmatpush3.msra.mxu1 %v1646_v22 }
 0x654   : > { %v1363_v60 = vpop.f32.mrf.mxu1 }
 0x655   : > { %1946 = vmatmul.mubr.msk.f32.vlgmr.msra.gmra.mxu0 %vm794_vm3, %v1363_v60 }
 0x656   : > { %v1942_v61 = vpop.f32.mrf.mxu1  ;;  %1955 = vmatprep.mubr.msk.f32.mxu0 %vm1994_vm1, %v1993_v1  ;;  %1954 = vmatpush3.msk.msra.mxu0 %vm557_vm0, %v1561_v13 }
 0x658   : > { %v1518_v62 = vpop.f32.mrf.mxu1 }
 0x65a   : > { %v1952_v63 = vpop.f32.mrf.mxu1 }
 0x715   : > { %v1442_v0 = vpop.f32.mrf.mxu0 }
 0x716   : > { %v1519_v4 = vadd.f32 %v1518_v62, %v1442_v0 }
 0x717   : > { %v1947_v5 = vpop.f32.mrf.mxu0 }
 0x718   : > { %v1529_v6 = vadd.f32 %v1853_v2, %v1519_v4 }
 0x71a   : > { %v1530_v7 = vadd.f32 %v1529_v6, %v2117_v3 }
 0x71c   : > { %v1533_v8 = vsel %vm553_vm2, %v1530_v7, 0.0 }
 0x71d   : > { %1534 = vadd.xlane.f32.xlu0 %v1533_v8 }
 0x7a6   : > { %v1535_v9 = vpop.xlane.xlu0 %1534 }
 0x7a7   : > { %v1537_v10 = vmul.f32 0.25, %v1535_v9 }
 0x7a9   : > { %v1538_v11 = vsub.f32 %v1530_v7, %v1537_v10 }
 0x7ab   : > { %v1539_v12 = vmul.f32 %v1538_v11, %v1538_v11 }
 0x7ad   : > { %v1540_v1 = vsel %vm553_vm2, %v1539_v12, 0.0 }
 0x7ae   : > { %1541 = vadd.xlane.f32.xlu1 %v1540_v1 }
 0x837   : > { %v1542_v14 = vpop.xlane.xlu1 %1541 }
 0x838   : > { %v1543_v15 = vmul.f32 0.25, %v1542_v14 }
 0x83a   : > { %v1544_v16 = vadd.f32 1e-05, %v1543_v15 }
 0x83c   : > { %1981 = vrsqrt.f32 %v1544_v16 }
 0x849   : > { %v1982_v3 = vpop.eup %1981 }
 0x84a   : > { %v1546_v18 = vmul.f32 %v1982_v3, %v1538_v11 }
 0x84c   : > { %v1553_v20 = vmul.f32 %v1854_v17, %v1546_v18 }
 0x84e   : > { %v1560_v21 = vadd.f32 %v1855_v19, %v1553_v20 }
 0x850   : > { %1956 = vmatmul.mubr.msk.f32.vlgmr.msra.gmra.mxu0 %vm553_vm2, %v1560_v21 }
 0x910   : > { %v1641_v24 = vpop.f32.mrf.mxu0 }
 0x911   : > { %v1642_v25 = vadd.f32 %v1856_v23, %v1641_v24 }
 0x912   : > { %v1957_v26 = vpop.f32.mrf.mxu0 }
 0x913   : > { %v1645_v27 = vmax.f32 %v1642_v25, 0.0 }
 0x915   : > { %1961 = vmatmul.mubr.msk.f32.vlgmr.msra.gmra.mxu1 %vm871_vm4, %v1645_v27 }
 0x9d5   : > { %v1723_v29 = vpop.f32.mrf.mxu1 }
 0x9d6   : > { %v1724_v30 = vadd.f32 %v1859_v28, %v1723_v29 }
 0x9d7   : > { %v1962_v31 = vpop.f32.mrf.mxu1 }
 0x9d8   : > { %v1727_v32 = vadd.f32 %v1724_v30, %v1560_v21 }
 0x9da   : > { %v1730_v33 = vsel %vm553_vm2, %v1727_v32, 0.0 }
 0x9db   : > { %1731 = vadd.xlane.f32.xlu0 %v1730_v33 }
 0xa64   : > { %v1732_v34 = vpop.xlane.xlu0 %1731 }
 0xa65   : > { %v1733_v35 = vmul.f32 0.25, %v1732_v34 }
 0xa67   : > { %v1734_v36 = vsub.f32 %v1727_v32, %v1733_v35 }
 0xa69   : > { %v1735_v37 = vmul.f32 %v1734_v36, %v1734_v36 }
 0xa6b   : > { %v1736_v38 = vsel %vm553_vm2, %v1735_v37, 0.0 }
 0xa6c   : > { %1737 = vadd.xlane.f32.xlu1 %v1736_v38 }
 0xaf5   : > { %v1738_v39 = vpop.xlane.xlu1 %1737 }
 0xaf6   : > { %v1739_v40 = vmul.f32 0.25, %v1738_v39 }
 0xaf8   : > { %v1740_v41 = vadd.f32 1e-05, %v1739_v40 }
 0xafa   : > { %1983 = vrsqrt.f32 %v1740_v41 }
 0xb07   : > { %v1984_v42 = vpop.eup %1983 }
 0xb08   : > { %v1742_v44 = vmul.f32 %v1984_v42, %v1734_v36 }
 0xb0a   : > { %v1749_v46 = vmul.f32 %v1861_v43, %v1742_v44 }
 0xb0c   : > { %v1756_v47 = vadd.f32 %v1862_v45, %v1749_v46 }
 0xb0e   : > { %1757 = vst.msk [vmem:[%s543_s21] sm:$0xff] %vm553_vm2, %v1756_v47 }
 0xb0f PF: > { %s27_s24 = sadd.s32 1, %s1991_s24  }
 0xb10   : > { %p24_p4 = scmp.ge.s32.totalorder %s27_s24, 4  }
 0xb12   :  { %26 = sbr.rel (!%p24_p4) target bundleno = 3 (0x3), region = 125 }

</bundles_post_ra>
